<compile_context>
chip_gen: v5e
topology: v5e:2x2
jax: 0.10.0
libtpu: 0.0.40
codegen_flags: <defaults>
</compile_context>

<pallas_src>
import functools

import numpy as np

import jax
import jax.numpy as jnp
from jax.experimental import pallas as pl
from jax.experimental.pallas import tpu as pltpu


def _round_up(x, m):
    return (x + m - 1) // m * m


def _vmem_limit_bytes():
    """Generation-aware scoped-VMEM budget (3/4 of physical, capped)."""
    try:
        cap = int(getattr(pltpu.get_tpu_info(), "vmem_capacity_bytes", 64 << 20))
    except Exception:  # pragma: no cover - conservative fallback
        cap = 64 << 20
    return int(min(cap * 3 // 4, 100 << 20))


def _sage_layer_kernel(idx_ref, cnt_ref, a_ref, hsrc_ref, hdst_ref,
                       ws_ref, wn_ref, b_ref, out_ref, self_acc, neigh_acc):
    """One SAGE layer, grid = (dst_row_tiles, max_nnz_col_blocks).

    idx_ref  : SMEM (n_i * max_k,) int32  nonzero A column-block ids (prefetch)
    cnt_ref  : SMEM (n_i,)         int32  #valid column blocks per dst tile
    a_ref    : (TM, TK)     row-normalized adjacency tile (dst rows x src cols)
    hsrc_ref : (TK, Fp)     source-node features for this column block
    hdst_ref : (TM, Fp)     destination-node features (self term)
    ws_ref   : (Fp, Fp)     W_self  (pre-transposed: x @ W)
    wn_ref   : (Fp, Fp)     W_neigh (pre-transposed)
    b_ref    : (1, Fp)      bias (f32)
    out_ref  : (TM, Fp)     output features for this dst tile
    self_acc : (TM, Fp) f32 scratch  h_dst @ W_self
    neigh_acc: (TM, Fp) f32 scratch  running A @ h
    """
    i = pl.program_id(0)
    k = pl.program_id(1)

    @pl.when(k == 0)
    def _init():
        # Prologue half of the weight application: do the self-term matmul once
        # per dst row panel so the epilogue only has the W_neigh matmul left.
        self_acc[...] = jnp.dot(hdst_ref[...], ws_ref[...],
                                preferred_element_type=jnp.float32)
        neigh_acc[...] = jnp.zeros_like(neigh_acc)

    # Block-sparse mean aggregation: only the first cnt_ref[i] k-steps carry a
    # distinct nonzero A column block; padded steps repeat the previous block
    # index (no re-DMA thanks to revisit detection) and are skipped here.
    @pl.when(k < cnt_ref[i])
    def _accumulate():
        neigh_acc[...] += jnp.dot(a_ref[...], hsrc_ref[...],
                                  preferred_element_type=jnp.float32)

    @pl.when(k == pl.num_programs(1) - 1)
    def _finalize():
        out = (self_acc[...]
               + jnp.dot(neigh_acc[...].astype(wn_ref.dtype), wn_ref[...],
                         preferred_element_type=jnp.float32)
               + b_ref[...])
        out_ref[...] = out.astype(out_ref.dtype)


@functools.lru_cache(maxsize=None)
def _make_layer_call(n_pad, f_pad, tm, tk, max_k, compute_dtype_name):
    compute_dtype = jnp.dtype(compute_dtype_name)
    grid = (n_pad // tm, max_k)

    # index_maps get the scalar-prefetch refs as trailing positional args.
    def a_map(i, k, idx, cnt):
        return (i, idx[i * max_k + k])

    def hsrc_map(i, k, idx, cnt):
        return (idx[i * max_k + k], 0)

    def hdst_map(i, k, idx, cnt):
        return (i, 0)

    def const_map(i, k, idx, cnt):
        return (0, 0)

    def out_map(i, k, idx, cnt):
        return (i, 0)

    return pl.pallas_call(
        _sage_layer_kernel,
        out_shape=jax.ShapeDtypeStruct((n_pad, f_pad), compute_dtype),
        grid_spec=pltpu.PrefetchScalarGridSpec(
            num_scalar_prefetch=2,
            grid=grid,
            in_specs=[
                # TODO(synk): if a profile shows exposed DMA at each row-panel
                # boundary, add pipeline_mode=pl.Buffered(3) on the A tile.
                pl.BlockSpec((tm, tk), a_map),             # A tile (sparse k)
                pl.BlockSpec((tk, f_pad), hsrc_map),       # h, source rows
                pl.BlockSpec((tm, f_pad), hdst_map),       # h, destination rows
                pl.BlockSpec((f_pad, f_pad), const_map),   # W_self (resident)
                pl.BlockSpec((f_pad, f_pad), const_map),   # W_neigh (resident)
                pl.BlockSpec((1, f_pad), const_map),       # bias
            ],
            out_specs=pl.BlockSpec((tm, f_pad), out_map),
            scratch_shapes=[pltpu.VMEM((tm, f_pad), jnp.float32),   # self_acc
                            pltpu.VMEM((tm, f_pad), jnp.float32)],  # neigh_acc
        ),
        compiler_params=pltpu.CompilerParams(
            dimension_semantics=("parallel", "arbitrary"),
            vmem_limit_bytes=_vmem_limit_bytes(),
        ),
    )


def graphsage_forward(a_mean, feat, w_self, w_neigh, bias,
                      compute_dtype=jnp.bfloat16):
    """GraphSAGE forward (4 stacked mean-aggregator SAGEConv layers).

    a_mean : (N, N)    row-normalized dense adjacency (mean aggregation matrix)
    feat   : (N, F)    input node features
    w_self : (L, F, F) self-weights, pre-transposed (x @ W == PyTorch x @ W^T)
    w_neigh: (L, F, F) neighbor-weights, pre-transposed
    bias   : (L, F)    biases
    compute_dtype: streaming dtype for A / h / W.  bf16 (default) halves HBM
        traffic on every generation; accumulation is always f32.  Use f32 for
        a bit-tighter result (expect ~1e-2 relative error on the bf16 path).
    """
    N, F = feat.shape
    L = w_self.shape[0]
    cdt = jnp.dtype(compute_dtype)

    # Lane-dense feature padding (multiple of 128).  129..255 features pad to
    # 256 so both matmul output widths fill the 256-wide v6e/v7x MXU.  Padded
    # lanes stay exactly zero through all layers (zero weight rows/cols, zero
    # bias lanes).
    f_pad = _round_up(max(F, 128), 128)

    # Node-dim padding and tile choice.
    if N <= 512:
        n_pad = _round_up(N, 128)      # lane-dense A loads, full MXU K
        tk = n_pad
        tm = max(n_pad // 2, 64)       # >=2 dst row tiles -> both v7x TCs work
    else:
        tm = tk = 512                  # >=512 tiles reach ~85% of HBM roofline
        n_pad = _round_up(N, tk)       # tm == tk: pad granularity is one tile

    # --- host-side block-sparse schedule for the k (source-column) axis -----
    n_i = n_pad // tm
    n_k = n_pad // tk
    a_host = np.zeros((n_pad, n_pad), np.float32)
    a_host[:N, :N] = np.asarray(jax.device_get(a_mean), np.float32)
    blk_nnz = a_host.reshape(n_i, tm, n_k, tk).any(axis=(1, 3))   # (n_i, n_k)
    cnts = blk_nnz.sum(axis=1).astype(np.int32)
    max_k = int(max(1, cnts.max()))
    blk_idx = np.zeros((n_i, max_k), np.int32)
    for i in range(n_i):
        nz = np.nonzero(blk_nnz[i])[0].astype(np.int32)
        if nz.size:
            blk_idx[i, :nz.size] = nz
            blk_idx[i, nz.size:] = nz[-1]   # repeat last block: no extra DMA
    blk_idx_dev = jnp.asarray(blk_idx.reshape(-1))   # flat 1-D SMEM (cheap pad)
    blk_cnt_dev = jnp.asarray(cnts)

    # --- device-side padded operands (streamed in compute_dtype) ------------
    a_p = jnp.asarray(a_host, cdt)
    h = jnp.zeros((n_pad, f_pad), cdt).at[:N, :F].set(feat.astype(cdt))

    ws_p = jnp.zeros((L, f_pad, f_pad), cdt).at[:, :F, :F].set(w_self.astype(cdt))
    wn_p = jnp.zeros((L, f_pad, f_pad), cdt).at[:, :F, :F].set(w_neigh.astype(cdt))
    b_p = jnp.zeros((L, 1, f_pad), jnp.float32).at[:, 0, :F].set(
        bias.astype(jnp.float32))
    # NOTE: padded dst rows (>= N) pick up the bias in intermediate layers;
    # this never leaks into real rows because A's padded columns are zero and
    # those rows are sliced off at the end.

    layer_call = _make_layer_call(n_pad, f_pad, tm, tk, max_k, cdt.name)

    # Static unroll over the (fixed, small) layer count: one pallas_call per
    # layer, so only the current layer's weights get DMA'd into VMEM.
    for l in range(L):
        h = layer_call(blk_idx_dev, blk_cnt_dev, a_p, h, h,
                       ws_p[l], wn_p[l], b_p[l])

    # TODO(synk): for F >= ~2048 on v7x, add a third grid axis tiling the
    # weight/output feature dim so the resident W_self/W_neigh stay under the
    # 64 MiB VMEM budget.
    return h[:N, :F].astype(feat.dtype)


def graphsage_reference(a_mean, feat, w_self, w_neigh, bias):
    """Pure-JAX f32 reference of the same forward, for correctness checks."""
    h = feat
    for i in range(w_self.shape[0]):
        h_neigh = a_mean @ h
        h = h @ w_self[i] + h_neigh @ w_neigh[i] + bias[i][None, :]
    return h


if __name__ == "__main__":
    # Small synthetic problem: 16 nodes, feature size 32, 4 SAGE layers.
    # (in_feats == out_feats is required for the PyTorch module to stack.)
    N, F, L = 16, 32, 4

    key = jax.random.PRNGKey(0)
    k_edges, k_feat, k_ws, k_wn = jax.random.split(key, 4)

    # Deterministic random graph: directed edges j -> i with p = 0.3.
    edges = jax.random.bernoulli(k_edges, p=0.3, shape=(N, N)).astype(jnp.float32)
    # Row-normalized mean-aggregation matrix (zero rows for isolated nodes,
    # matching DGL's mean reducer).
    in_deg = edges.sum(axis=1, keepdims=True)
    a_mean = jnp.where(in_deg > 0, edges / jnp.maximum(in_deg, 1.0), 0.0)
    a_mean = a_mean.astype(jnp.float32)

    feat = jax.random.normal(k_feat, (N, F), dtype=jnp.float32)
    scale = 1.0 / jnp.sqrt(jnp.float32(F))
    # Stored as (F_in, F_out), i.e. pre-transposed relative to nn.Linear.weight.
    w_self = jax.random.normal(k_ws, (L, F, F), dtype=jnp.float32) * scale
    w_neigh = jax.random.normal(k_wn, (L, F, F), dtype=jnp.float32) * scale
    bias = jnp.zeros((L, F), dtype=jnp.float32)  # DGL SAGEConv bias init = zeros

    ref = graphsage_reference(a_mean, feat, w_self, w_neigh, bias)

    # Exact-path check (f32 streaming).
    out_f32 = graphsage_forward(a_mean, feat, w_self, w_neigh, bias,
                                compute_dtype=jnp.float32)
    out_f32 = jax.block_until_ready(out_f32)
    assert out_f32.shape == (N, F)
    assert jnp.allclose(out_f32, ref, atol=1e-4, rtol=1e-4), "f32 mismatch vs reference"

    # Fast-path check (default bf16 streaming, f32 accumulation): looser
    # tolerance since bf16 quantization compounds over the 4 layers.
    out_bf16 = graphsage_forward(a_mean, feat, w_self, w_neigh, bias)
    out_bf16 = jax.block_until_ready(out_bf16)
    rel_err = jnp.linalg.norm(out_bf16 - ref) / jnp.linalg.norm(ref)
    assert out_bf16.shape == (N, F)
    assert rel_err < 2e-2, f"bf16 path relative error too large: {rel_err}"

    print("KERNEL_OK")
</pallas_src>

<mosaic_0001>
module attributes {stable_mosaic.version = 11 : i64} {
  func.func @_sage_layer_kernel(%arg0: i32, %arg1: i32, %arg2: memref<2xi32, #tpu.memory_space<smem>>, %arg3: memref<2xi32, #tpu.memory_space<smem>>, %arg4: memref<64x128xf32, #tpu.memory_space<vmem>>, %arg5: memref<128x128xf32, #tpu.memory_space<vmem>>, %arg6: memref<64x128xf32, #tpu.memory_space<vmem>>, %arg7: memref<128x128xf32, #tpu.memory_space<vmem>>, %arg8: memref<128x128xf32, #tpu.memory_space<vmem>>, %arg9: memref<1x128xf32, #tpu.memory_space<vmem>>, %arg10: memref<64x128xf32, #tpu.memory_space<vmem>>, %arg11: memref<64x128xf32, #tpu.memory_space<vmem>>, %arg12: memref<64x128xf32, #tpu.memory_space<vmem>>) attributes {dimension_semantics = [#tpu.dimension_semantics<parallel>, #tpu.dimension_semantics<arbitrary>], iteration_bounds = array<i64: 2, 1>, scalar_prefetch = 2 : i64, scratch_operands = 2 : i64, tpu.core_type = #tpu.core_type<tc>, window_params = [{transform_indices = @transform_0, window_bounds = array<i64: 64, 128>}, {transform_indices = @transform_1, window_bounds = array<i64: 128, 128>}, {transform_indices = @transform_2, window_bounds = array<i64: 64, 128>}, {pipeline_mode = #tpu.pipeline_mode<synchronous>, transform_indices = @transform_3, window_bounds = array<i64: 128, 128>}, {pipeline_mode = #tpu.pipeline_mode<synchronous>, transform_indices = @transform_4, window_bounds = array<i64: 128, 128>}, {pipeline_mode = #tpu.pipeline_mode<synchronous>, transform_indices = @transform_5, window_bounds = array<i64: 1, 128>}, {transform_indices = @transform_6, window_bounds = array<i64: 64, 128>}]} {
    %c0_i32 = arith.constant 0 : i32
    %0 = arith.cmpi eq, %arg1, %c0_i32 : i32
    %1 = arith.extui %0 : i1 to i32
    %c0_i32_0 = arith.constant 0 : i32
    %2 = arith.cmpi ne, %1, %c0_i32_0 : i32
    scf.if %2 {
      %c0 = arith.constant 0 : index
      %c0_4 = arith.constant 0 : index
      %11 = vector.load %arg6[%c0, %c0_4] : memref<64x128xf32, #tpu.memory_space<vmem>>, vector<64x128xf32>
      %c0_5 = arith.constant 0 : index
      %c0_6 = arith.constant 0 : index
      %12 = vector.load %arg7[%c0_5, %c0_6] : memref<128x128xf32, #tpu.memory_space<vmem>>, vector<128x128xf32>
      %cst = arith.constant dense<0.000000e+00> : vector<64x128xf32>
      %13 = tpu.matmul %11, %12, %cst {dimension_numbers = #tpu.dot_dimension_numbers<[1], [0], [0], [1], [0, 0, 1, 1], [], []>} : vector<64x128xf32>, vector<128x128xf32>, vector<64x128xf32> -> vector<64x128xf32>
      %c0_7 = arith.constant 0 : index
      %c0_8 = arith.constant 0 : index
      %14 = vector.load %arg11[%c0_7, %c0_8] : memref<64x128xf32, #tpu.memory_space<vmem>>, vector<64x128xf32>
      tpu.vector_store %arg11[%c0_7, %c0_8], %13 {strides = array<i32>} : memref<64x128xf32, #tpu.memory_space<vmem>>, vector<64x128xf32>,
      %cst_9 = arith.constant 0.000000e+00 : f32
      %15 = vector.broadcast %cst_9 : f32 to vector<64x128xf32>
      %c0_10 = arith.constant 0 : index
      %c0_11 = arith.constant 0 : index
      %16 = vector.load %arg12[%c0_10, %c0_11] : memref<64x128xf32, #tpu.memory_space<vmem>>, vector<64x128xf32>
      tpu.vector_store %arg12[%c0_10, %c0_11], %15 {strides = array<i32>} : memref<64x128xf32, #tpu.memory_space<vmem>>, vector<64x128xf32>,
    } else {
    }
    %3 = arith.index_cast %arg0 : i32 to index
    %4 = memref.load %arg3[%3] : memref<2xi32, #tpu.memory_space<smem>>
    %5 = arith.cmpi slt, %arg1, %4 : i32
    %6 = arith.extui %5 : i1 to i32
    %c0_i32_1 = arith.constant 0 : i32
    %7 = arith.cmpi ne, %6, %c0_i32_1 : i32
    scf.if %7 {
      %c0 = arith.constant 0 : index
      %c0_4 = arith.constant 0 : index
      %11 = vector.load %arg12[%c0, %c0_4] : memref<64x128xf32, #tpu.memory_space<vmem>>, vector<64x128xf32>
      %c0_5 = arith.constant 0 : index
      %c0_6 = arith.constant 0 : index
      %12 = vector.load %arg4[%c0_5, %c0_6] : memref<64x128xf32, #tpu.memory_space<vmem>>, vector<64x128xf32>
      %c0_7 = arith.constant 0 : index
      %c0_8 = arith.constant 0 : index
      %13 = vector.load %arg5[%c0_7, %c0_8] : memref<128x128xf32, #tpu.memory_space<vmem>>, vector<128x128xf32>
      %cst = arith.constant dense<0.000000e+00> : vector<64x128xf32>
      %14 = tpu.matmul %12, %13, %cst {dimension_numbers = #tpu.dot_dimension_numbers<[1], [0], [0], [1], [0, 0, 1, 1], [], []>} : vector<64x128xf32>, vector<128x128xf32>, vector<64x128xf32> -> vector<64x128xf32>
      %15 = arith.addf %11, %14 : vector<64x128xf32>
      %c0_9 = arith.constant 0 : index
      %c0_10 = arith.constant 0 : index
      %16 = vector.load %arg12[%c0_9, %c0_10] : memref<64x128xf32, #tpu.memory_space<vmem>>, vector<64x128xf32>
      tpu.vector_store %arg12[%c0_9, %c0_10], %15 {strides = array<i32>} : memref<64x128xf32, #tpu.memory_space<vmem>>, vector<64x128xf32>,
    } else {
    }
    %c0_i32_2 = arith.constant 0 : i32
    %8 = arith.cmpi eq, %arg1, %c0_i32_2 : i32
    %9 = arith.extui %8 : i1 to i32
    %c0_i32_3 = arith.constant 0 : i32
    %10 = arith.cmpi ne, %9, %c0_i32_3 : i32
    scf.if %10 {
      %c0 = arith.constant 0 : index
      %c0_4 = arith.constant 0 : index
      %11 = vector.load %arg11[%c0, %c0_4] : memref<64x128xf32, #tpu.memory_space<vmem>>, vector<64x128xf32>
      %c0_5 = arith.constant 0 : index
      %c0_6 = arith.constant 0 : index
      %12 = vector.load %arg12[%c0_5, %c0_6] : memref<64x128xf32, #tpu.memory_space<vmem>>, vector<64x128xf32>
      %c0_7 = arith.constant 0 : index
      %c0_8 = arith.constant 0 : index
      %13 = vector.load %arg8[%c0_7, %c0_8] : memref<128x128xf32, #tpu.memory_space<vmem>>, vector<128x128xf32>
      %cst = arith.constant dense<0.000000e+00> : vector<64x128xf32>
      %14 = tpu.matmul %12, %13, %cst {dimension_numbers = #tpu.dot_dimension_numbers<[1], [0], [0], [1], [0, 0, 1, 1], [], []>} : vector<64x128xf32>, vector<128x128xf32>, vector<64x128xf32> -> vector<64x128xf32>
      %15 = arith.addf %11, %14 : vector<64x128xf32>
      %c0_9 = arith.constant 0 : index
      %c0_10 = arith.constant 0 : index
      %16 = vector.load %arg9[%c0_9, %c0_10] : memref<1x128xf32, #tpu.memory_space<vmem>>, vector<1x128xf32>
      %17 = vector.broadcast %16 : vector<1x128xf32> to vector<64x128xf32>
      %18 = arith.addf %15, %17 : vector<64x128xf32>
      %c0_11 = arith.constant 0 : index
      %c0_12 = arith.constant 0 : index
      %19 = vector.load %arg10[%c0_11, %c0_12] : memref<64x128xf32, #tpu.memory_space<vmem>>, vector<64x128xf32>
      tpu.vector_store %arg10[%c0_11, %c0_12], %18 {strides = array<i32>} : memref<64x128xf32, #tpu.memory_space<vmem>>, vector<64x128xf32>,
    } else {
    }
    return
  }
  func.func @transform_0(%arg0: i32, %arg1: i32, %arg2: memref<2xi32, #tpu.memory_space<smem>>, %arg3: memref<2xi32, #tpu.memory_space<smem>>) -> (i32, i32) {
    %c1_i32 = arith.constant 1 : i32
    %0 = arith.muli %arg0, %c1_i32 : i32
    %1 = arith.addi %0, %arg1 : i32
    %2 = arith.index_cast %1 : i32 to index
    %3 = memref.load %arg2[%2] : memref<2xi32, #tpu.memory_space<smem>>
    %c0_i32 = arith.constant 0 : i32
    return %arg0, %3 : i32, i32
  }
  func.func @transform_1(%arg0: i32, %arg1: i32, %arg2: memref<2xi32, #tpu.memory_space<smem>>, %arg3: memref<2xi32, #tpu.memory_space<smem>>) -> (i32, i32) {
    %c1_i32 = arith.constant 1 : i32
    %0 = arith.muli %arg0, %c1_i32 : i32
    %1 = arith.addi %0, %arg1 : i32
    %2 = arith.index_cast %1 : i32 to index
    %3 = memref.load %arg2[%2] : memref<2xi32, #tpu.memory_space<smem>>
    %c0_i32 = arith.constant 0 : i32
    %c0_i32_0 = arith.constant 0 : i32
    return %3, %c0_i32 : i32, i32
  }
  func.func @transform_2(%arg0: i32, %arg1: i32, %arg2: memref<2xi32, #tpu.memory_space<smem>>, %arg3: memref<2xi32, #tpu.memory_space<smem>>) -> (i32, i32) {
    %c0_i32 = arith.constant 0 : i32
    %c0_i32_0 = arith.constant 0 : i32
    return %arg0, %c0_i32 : i32, i32
  }
  func.func @transform_3(%arg0: i32, %arg1: i32, %arg2: memref<2xi32, #tpu.memory_space<smem>>, %arg3: memref<2xi32, #tpu.memory_space<smem>>) -> (i32, i32) {
    %c0_i32 = arith.constant 0 : i32
    %c0_i32_0 = arith.constant 0 : i32
    %c0_i32_1 = arith.constant 0 : i32
    return %c0_i32, %c0_i32_0 : i32, i32
  }
  func.func @transform_4(%arg0: i32, %arg1: i32, %arg2: memref<2xi32, #tpu.memory_space<smem>>, %arg3: memref<2xi32, #tpu.memory_space<smem>>) -> (i32, i32) {
    %c0_i32 = arith.constant 0 : i32
    %c0_i32_0 = arith.constant 0 : i32
    %c0_i32_1 = arith.constant 0 : i32
    return %c0_i32, %c0_i32_0 : i32, i32
  }
  func.func @transform_5(%arg0: i32, %arg1: i32, %arg2: memref<2xi32, #tpu.memory_space<smem>>, %arg3: memref<2xi32, #tpu.memory_space<smem>>) -> (i32, i32) {
    %c0_i32 = arith.constant 0 : i32
    %c0_i32_0 = arith.constant 0 : i32
    %c0_i32_1 = arith.constant 0 : i32
    return %c0_i32, %c0_i32_0 : i32, i32
  }
  func.func @transform_6(%arg0: i32, %arg1: i32, %arg2: memref<2xi32, #tpu.memory_space<smem>>, %arg3: memref<2xi32, #tpu.memory_space<smem>>) -> (i32, i32) {
    %c0_i32 = arith.constant 0 : i32
    %c0_i32_0 = arith.constant 0 : i32
    return %arg0, %c0_i32 : i32, i32
  }
}

</mosaic_0001>

<bundles_post_ra>
// kernel: tpu_custom_call.1
= control target key start
LH: loop header
LB: loop body
LE: loop exit
PB: predicated region body
PF: predicated region fallthrough
CT: control target
= control target key end

     0   :  { %s1533_s11 = smov [#allocation5]   ;;  %s1534_s12 = smov [#allocation6]   ;;  %s2019_s0 = inlined_call_operand.hbm [shape: s32[2], index: 0, kind: input, shape index: {}]   ;;  %s2020_s2 = inlined_call_operand.hbm [shape: f32[128,128], index: 2, kind: input, shape index: {}]   ;;  %s2021_s3 = inlined_call_operand.hbm [shape: f32[128,128], index: 3, kind: input, shape index: {}]   ;;  %s2022_s4 = inlined_call_operand.hbm [shape: f32[128,128], index: 4, kind: input, shape index: {}]   ;;  %s2023_s5 = inlined_call_operand.hbm [shape: f32[128,128], index: 5, kind: input, shape index: {}]   ;;  %s2024_s6 = inlined_call_operand.hbm [shape: f32[128,128], index: 6, kind: input, shape index: {}]   ;;  %s2025_s7 = inlined_call_operand.vmem [shape: f32[1,128], index: 7, kind: input, shape index: {}]   ;;  %s2026_s8 = inlined_call_operand.hbm [shape: f32[128,128], index: 8, kind: output, shape index: {}]   ;;  %s2027_s1 = inlined_call_operand.hbm [shape: s32[2], index: 1, kind: input, shape index: {}]  }
   0x1   :  { %2045 = sst [smem:[#allocation36_spill]] %s2020_s2  ;;  %s14_s29 = sshll.u32 %s2019_s0, 4  ;;  %s15_s29 = int_to_ptr.hbm [resolvable:$true] %s14_s29 }
   0x2   :  { %2046 = sst [smem:[#allocation37_spill]] %s2021_s3  ;;  %s19_s10 = sshll.u32 %s2027_s1, 4  ;;  %s20_s10 = int_to_ptr.hbm [resolvable:$true] %s19_s10 }
   0x3   :  { %2047 = sst [smem:[#allocation38_spill]] %s2022_s4 }
   0x4   :  { %2048 = sst [smem:[#allocation39_spill]] %s2023_s5 }
   0x5   :  { %2049 = sst [smem:[#allocation40_spill]] %s2024_s6 }
   0x6   :  { %2050 = sst [smem:[#allocation41_spill]] %s2025_s7 }
   0x7   :  { %2051 = sst [smem:[#allocation42_spill]] %s2026_s8 }
   0x8   :  { %17 = dma.hbm_to_smem %s15_s29, 16, %s1533_s11, [#allocation4] }
   0x9   :  { %22 = dma.hbm_to_smem %s20_s10, 16, %s1534_s12, [#allocation4] }
   0xa   :  { %1463 = dma.done.wait [#allocation4], 32 }
   0xb   :  { %1464 = vsyncadd [#allocation4], 4294967264 }
   0xc   :  { %25 = sfence }
   0xd   :  { %26 = vsyncpa [#allocation8], 0 }
   0xe   :  { %28 = vsyncpa [#allocation8 + $0x1], 0 }
   0xf   :  { %29 = vsyncpa [#allocation11], 0 }
  0x10   :  { %31 = vsyncpa [#allocation11 + $0x1], 0 }
  0x11   :  { %32 = vsyncpa [#allocation14], 0 }
  0x12   :  { %33 = vsyncpa [#allocation9], 0 }
  0x13   :  { %35 = vsyncpa [#allocation9 + $0x1], 0  ;;  %s1593_s0 = smov 0   ;;  %s1595_s13 = smov 0  }
  0x14   :  { %s1597_s1 = smov 0   ;;  %s1599_s14 = smov 0  }
  0x15   :  { %s1601_s15 = smov 0   ;;  %s1603_s16 = smov 0  }
  0x16   :  { %s1605_s17 = smov 0   ;;  %s1607_s18 = smov 0  }
  0x17   :  { %s1609_s19 = smov 0   ;;  %s1611_s20 = smov 0  }
  0x18   :  { %s1613_s21 = smov 0   ;;  %s1615_s22 = smov 0  }
  0x19 LB: > { %2052 = sst [smem:[#allocation27_spill]] %s1503_s15  ;;  %s1654_s23 = sadd.s32 4294967295, %s1531_s22   ;;  %s1531_s22 = sphi %s1615_s22, %s41_s22   ;;  %s1527_s21 = sphi %s1613_s21, %s2109_s21   ;;  %s1523_s20 = sphi %s1611_s20, %s2108_s20   ;;  %s1519_s19 = sphi %s1609_s19, %s2107_s19   ;;  %s1515_s18 = sphi %s1607_s18, %s2106_s18   ;;  %s1511_s17 = sphi %s1605_s17, %s2105_s17   ;;  %s1507_s16 = sphi %s1603_s16, %s2099_s16   ;;  %s1503_s15 = sphi %s1601_s15, %s2098_s15   ;;  %s1499_s14 = sphi %s1599_s14, %s2097_s14   ;;  %s1495_s1 = sphi %s1597_s1, %s2104_s1   ;;  %s1491_s13 = sphi %s1595_s13, %s2103_s13   ;;  %s1487_s0 = sphi %s1593_s0, %s2102_s0  }
  0x1a   : > { %2053 = sst [smem:[#allocation28_spill]] %s1507_s16  ;;  %p882_p0 = scmp.ge.s32.totalorder %s1531_s22, 1 }
  0x1b   : > { %2054 = sst [smem:[#allocation29_spill]] %s1523_s20  ;;  %p2042_p1 = scmp.eq.s32.totalorder %s1654_s23, 0 }
  0x1c   : > { %p235_p3 = scmp.lt.s32.totalorder %s1531_s22, 3  ;;  %s2055_s5 = sld [smem:[#allocation39_spill]] }
  0x1d   : > { %s1535_s28 = smov [#allocation13]   ;;  %s2028_s9 = smov 128  }
  0x1e   : > { %p1663_p4 = pnand %p882_p0, %p235_p3  ;;  %s248_s29 = sshll.u32 %s1535_s28, 4  ;;  %s249_s29 = int_to_ptr.vmem [resolvable:$true] %s248_s29 }
  0x1f   : > { %s2030_s10 = smov 8   ;;  %s53_s11 = sadd.s32 1, %s1527_s21 }
  0x20   : > { %s2056_s27 = scalar_select %p1663_p4, 1, 0 }
  0x21   : > { %p1076_p5 = pneg %p1663_p4  ;;  %p74_p8 = scmp.eq.s32.totalorder %s1531_s22, 0 }
  0x22   : > { %s246_s26 = sshll.u32 %s2055_s5, 4  ;;  %2057 = sst [smem:[#allocation30_spill]] %s2056_s27  ;;  %s247_s26 = int_to_ptr.hbm [resolvable:$true] %s246_s26 }
  0x23   : > { %p1672_p7 = pnand %p1076_p5, %p2042_p1  ;;  %p55_p9 = scmp.ge.s32.totalorder %s53_s11, 2 }
  0x24   : > { %s90_s12 = sld [smem:[#allocation5 + %s1527_s21]]  ;;  %s96_s24 = sadd.s32 1, %s1507_s16 }
  0x25   : > { %1079 = dma.hbm_to_vmem [thread:$0]  (!%p1672_p7), %s247_s26, 2048, %s249_s29, [#allocation14], %s2028_s9, %s2028_s9, %s2030_s10  }
  0x26   : > { %p103_p10 = scmp.ne.s32.totalorder %s1507_s16, %s1503_s15  ;;  %s2111_s11 = smov (%p55_p9, %s53_s11), 0 }
  0x27   : > { %2059 = sst [smem:[#allocation31_spill]] %s2111_s11  ;;  %p109_p12 = scmp.ne.s32.totalorder %s1503_s15, %s1499_s14 }
  0x28   : > { %p1691_p11 = por %p103_p10, %p74_p8  ;;  %s92_s26 = sld [smem:[#allocation5 + %s2111_s11]] }
  0x29   : > { %p2040_p13 = scmp.lt.s32.totalorder %s1531_s22, 2  ;;  %p1701_p0 = por %p109_p12, %p2042_p1 }
  0x2a   : > { %s304_s29 = sand.u32 1, %s1531_s22   ;;  %s306_s9 = sand.u32 1, %s1507_s16  }
  0x2b   : > { %s2061_s28 = scalar_select %p1701_p0, 1, 0 }
  0x2c   : > { %s889_s10 = sshll.u32 %s306_s9, 7  ;;  %p1711_p3 = pnand %p2040_p13, %p1691_p11 }
  0x2d   : > { %2062 = sst [smem:[#allocation32_spill]] %s2061_s28  ;;  %s308_s27 = scalar_lea.vmem [#allocation10], %s889_s10 }
  0x2e   : > { %s2064_s6 = sld [smem:[#allocation40_spill]]  ;;  %s93_s15 = ssub.s32 %s90_s12, %s92_s26 }
  0x2f   : > { %s1063_s20 = scalar_select %p1691_p11, [#allocation5], [#allocation18] }
  0x30   : > { %s1720_s28 = sshll.u32 %s308_s27, 4  ;;  %p94_p5 = scmp.eq.s32.totalorder %s93_s15, 0 }
  0x31   : > { %2065 = sst [smem:[#allocation33_spill]] %s1720_s28  ;;  %s2113_s20 = smov (!%p2040_p13, %s1063_s20), [#allocation20] }
  0x32   : > { %s1064_s9 = scalar_select %p1691_p11, %s1527_s21, 0 }
  0x33   : > { %s1727_s4 = scalar_select %p94_p5, %s1507_s16, %s96_s24  }
  0x34   : > { %s260_s7 = sshll.u32 %s2064_s6, 4  ;;  %s2115_s9 = smov (!%p2040_p13, %s1064_s9), 0  ;;  %s261_s7 = int_to_ptr.hbm [resolvable:$true] %s260_s7 }
  0x35   : > { %2066 = sst [smem:[#allocation34_spill]] %s1727_s4  ;;  %s1538_s10 = smov [#allocation15]  }
  0x36   : > { %s310_s8 = sld [smem:[%s2113_s20 + %s2115_s9]]  ;;  %s262_s27 = sshll.u32 %s1538_s10, 4  ;;  %s263_s27 = int_to_ptr.vmem [resolvable:$true] %s262_s27 }
  0x37   : > { %s2067_s15 = smov 8   ;;  %s2068_s12 = smov 128  }
  0x38   : > { %1082 = dma.hbm_to_vmem [thread:$0]  (!%p1672_p7), %s261_s7, 2048, %s263_s27, [#allocation14], %s2068_s12, %s2068_s12, %s2067_s15  }
  0x39   : > { %s1739_s26 = sld [smem:[#allocation5 + %s1527_s21]]  ;;  %s1747_s16 = ssub.s32 %s1527_s21, %s2111_s11 }
  0x3a   : > { %s2069_s3 = sld [smem:[#allocation37_spill]]  ;;  %s66_s20 = sadd.s32 1, %s1519_s19 }
  0x3b   : > { %s60_s6 = sld [smem:[#allocation5 + %s2111_s11]]  ;;  %s1750_s9 = scalar_lea.sflag [#allocation11], %s304_s29 }
  0x3c   : > { %s909_s25 = sshll.u32 %s310_s8, 7  ;;  %p1301_p7 = pneg %p1711_p3 }
  0x40   : > { %s315_s28 = scalar_lea.hbm %s2069_s3, %s909_s25  ;;  %s1304_s27 = scalar_lea.hbm %s2069_s3, 128 }
  0x41   : > { %s316_s4 = sshll.u32 %s315_s28, 4  ;;  %s317_s4 = int_to_ptr.hbm [resolvable:$true] %s316_s4 }
  0x42   : > { %s1297_s30 = sshra.s32 %s317_s4, 4  ;;  %s1298_s30 = int_to_ptr.hbm [resolvable:$true] %s1297_s30 }
  0x43   : > { %s1299_s10 = scalar_lea.hbm %s1298_s30, 128  ;;  %p1305_p12 = scmp.lt.s32.totalorder %s1298_s30, %s2069_s3 }
  0x44   : > { %p1300_p9 = scmp.ne.s32.totalorder %s1298_s30, %s1299_s10  ;;  %p1306_p5 = scmp.lt.s32.totalorder %s1304_s27, %s1299_s10 }
  0x46   : > { %p1302_p10 = pnand %p1301_p7, %p1300_p9  ;;  %p1307_p6 = por %p1306_p5, %p1305_p12 }
  0x48   : > { %p1303_p11 = pneg %p1302_p10 }
  0x4a   : > { %p1308_p2 = pnand %p1307_p6, %p1303_p11 }
  0x4c   : > { %1311 = shalt.err (!%p1308_p2)
}
  0x4d   : > { %s2070_s29 = sld [smem:[#allocation33_spill]]  ;;  %p73_p2 = scmp.ne.s32.totalorder %s1519_s19, %s1515_s18 }
  0x4e   : > { %p79_p6 = scmp.ne.s32.totalorder %s1515_s18, %s1511_s17  ;;  %p120_p9 = scmp.eq.s32.totalorder %s1747_s16, 0 }
  0x4f   : > { %s2039_s5 = sand.u32 1, %s1519_s19   ;;  %s62_s14 = ssub.s32 %s1739_s26, %s60_s6 }
  0x50   : > { %p75_p7 = por %p74_p8, %p73_p2  ;;  %s63_s30 = sor.u32 %s62_s14, %s1747_s16 }
  0x51   : > { %p1780_p10 = por %p2042_p1, %p79_p6  ;;  %s887_s17 = sshll.u32 %s1527_s21, 3 }
  0x52   : > { %p1792_p11 = pnand %p2040_p13, %p75_p7  ;;  %p129_p12 = scmp.ne.s32.totalorder %s1495_s1, %s1491_s13 }
  0x53   : > { %s2071_s24 = int_to_ptr.vmem [resolvable:$true] %s2070_s29  ;;  %s122_s29 = sadd.s32 1, %s1495_s1 }
  0x54   : > { %1093 = dma.hbm_to_vmem [thread:$0]  (!%p1711_p3), %s317_s4, 2048, %s2071_s24, %s1750_s9, %s2068_s12, %s2068_s12, %s2067_s15  }
  0x55   : > { %p64_p3 = scmp.eq.s32.totalorder %s63_s30, 0  ;;  %s886_s4 = sshll.u32 %s2039_s5, 6 }
  0x56   : > { %s1060_s26 = scalar_select %p75_p7, [#allocation5], [#allocation17] }
  0x57   : > { %s1788_s7 = scalar_select %p64_p3, %s1519_s19, %s66_s20  }
  0x58   : > { %s1061_s8 = scalar_select %p75_p7, %s1527_s21, 0 }
  0x59   : > { %2073 = sst [smem:[#allocation35_spill]] %s1788_s7  ;;  %s2117_s26 = smov (!%p2040_p13, %s1060_s26), [#allocation19] }
  0x5a   : > { %s2119_s8 = smov (!%p2040_p13, %s1061_s8), 0  ;;  %s283_s27 = scalar_lea.vmem [#allocation7], %s886_s4 }
  0x5b   : > { %s1801_s20 = sshll.u32 %s283_s27, 4  ;;  %s285_s25 = sld [smem:[%s2117_s26 + %s2119_s8]]  ;;  %s295_s20 = int_to_ptr.vmem [resolvable:$true] %s1801_s20 }
  0x5c   : > { %s1809_s24 = scalar_select %p120_p9, %s1495_s1, %s122_s29  }
  0x5d   : > { %p2043_p5 = scmp.ne.s32.totalorder %s1491_s13, %s1487_s0  ;;  %s2075_s2 = sld [smem:[#allocation36_spill]] }
  0x5e   : > { %p1820_p2 = por %p129_p12, %p74_p8  ;;  %p2078_p9 = scmp.eq.s32.totalorder %s1654_s23, 1 }
  0x5f   : > { %p1829_p6 = por %p2043_p5, %p2042_p1  ;;  %s2080_s3 = sand.u32 1, %s1519_s19  }
  0x60   : > { %p1835_p7 = por %p2078_p9, %p129_p12  ;;  %s280_s5 = scalar_lea.sflag [#allocation8], %s2080_s3 }
  0x61   : > { %s289_s14 = sadd.s32 %s887_s17, %s285_s25  ;;  %p1331_p3 = pneg %p1792_p11 }
  0x62   : > { %s888_s30 = sshll.u32 %s289_s14, 3 }
  0x63   : > { %s291_s4 = scalar_lea.hbm %s2075_s2, %s888_s30  ;;  %s1334_s30 = scalar_lea.hbm %s2075_s2, 128 }
  0x64   : > { %s292_s26 = sshll.u32 %s291_s4, 4  ;;  %s293_s26 = int_to_ptr.hbm [resolvable:$true] %s292_s26 }
  0x65   : > { %s1327_s8 = sshra.s32 %s293_s26, 4  ;;  %s1328_s8 = int_to_ptr.hbm [resolvable:$true] %s1327_s8 }
  0x66   : > { %s1329_s25 = scalar_lea.hbm %s1328_s8, 64  ;;  %p1335_p12 = scmp.lt.s32.totalorder %s1328_s8, %s2075_s2 }
  0x67   : > { %p1330_p8 = scmp.ne.s32.totalorder %s1328_s8, %s1329_s25  ;;  %p1336_p9 = scmp.lt.s32.totalorder %s1334_s30, %s1329_s25 }
  0x69   : > { %p1332_p13 = pnand %p1331_p3, %p1330_p8  ;;  %p1337_p1 = por %p1336_p9, %p1335_p12 }
  0x6b   : > { %p1333_p0 = pneg %p1332_p13 }
  0x6d   : > { %p1338_p5 = pnand %p1337_p1, %p1333_p0 }
  0x6f   : > { %1341 = shalt.err (!%p1338_p5)
}
  0x70   : > { %1088 = dma.hbm_to_vmem [thread:$0]  (!%p1792_p11), %s293_s26, 1024, %s295_s20, %s280_s5, %s2068_s12, %s2068_s12, %s2067_s15  }
  0x71   : > { %s2081_s28 = sadd.s32 4294967294, %s1531_s22   ;;  %s330_s3 = sand.u32 1, %s1495_s1  }
  0x72   : > { %p228_p13 = scmp.eq.s32.totalorder %s2081_s28, 1  ;;  %s892_s8 = sshll.u32 %s330_s3, 6 }
  0x73   : > { %s910_s25 = sshll.u32 %s1527_s21, 6  ;;  %p2082_p1 = scmp.ne.s32.totalorder %s1491_s13, %s1487_s0 }
  0x74   : > { %s2084_s30 = sld [smem:[#allocation38_spill]]  ;;  %s332_s2 = scalar_lea.vmem [#allocation12], %s892_s8 }
  0x75   : > { %p1863_p0 = por %p228_p13, %p2082_p1  ;;  %s340_s11 = sshll.u32 %s332_s2, 4  ;;  %s341_s11 = int_to_ptr.vmem [resolvable:$true] %s340_s11 }
  0x76   : > { %p2085_p11 = scmp.lt.s32.totalorder %s1531_s22, 2  ;;  %s354_s26 = sand.u32 (!%p1663_p4), 1, %s1515_s18  }
  0x77   : > { %s896_s5 = sshll.u32 (!%p1663_p4), %s354_s26, 6  ;;  %s355_s28 = scalar_lea.sflag (!%p1663_p4), [#allocation8], %s354_s26 }
  0x78   : > { %p1094_p5 = pnand %p2085_p11, %p1820_p2  ;;  %352 = sbr.rel (%p1663_p4) target bundleno = 674 (0x2a2), region = 44 }
  0x79   : > { %s1881_s3 = scalar_lea.vmem (!%p1663_p4), [#allocation7], %s896_s5 }
  0x7a   : > { %s337_s4 = scalar_lea.hbm %s2084_s30, %s910_s25 }
  0x7b   : > { %s338_s7 = sshll.u32 %s337_s4, 4  ;;  %s339_s7 = int_to_ptr.hbm [resolvable:$true] %s338_s7 }
  0x7c   : > { %1096 = dma.hbm_to_vmem [thread:$0]  (!%p1094_p5), %s339_s7, 1024, %s341_s11, %s1750_s9, %s2068_s12, %s2068_s12, %s2067_s15  }
  0x7d   : > { %1466 = dma.done.wait (%p1780_p10), %s355_s28, 1024  }
  0x7e   : > { %1468 = vsyncadd (%p1780_p10), %s355_s28, 4294966272  ;;  %s2087_s2 = sld [smem:[#allocation27_spill]]  ;;  %s364_s8 = sand.u32 1, %s1654_s23  }
  0x7f   : > { %s2088_s27 = sld [smem:[#allocation32_spill]]  ;;  %s365_s12 = scalar_lea.sflag [#allocation11], %s364_s8 }
  0x84   : > { %s366_s11 = sand.u32 1, %s2087_s2  }
  0x85   : > { %s897_s15 = sshll.u32 %s366_s11, 7  ;;  %p2089_p4 = scmp.ne.s32.totalorder %s2088_s27, 0 }
  0x86   : > { %s1889_s9 = scalar_lea.vmem [#allocation10], %s897_s15 }
  0x87   : > { %1470 = dma.done.wait (%p2089_p4), %s365_s12, 2048  }
  0x88   : > { %1472 = vsyncadd (%p2089_p4), %s365_s12, 4294965248  ;;  %s376_s7 = sand.u32 1, %s1491_s13  }
  0x89   : > { %s1898_s10 = sshll.u32 %s376_s7, 6 }
  0x8a   : > { %s1901_s25 = scalar_lea.vmem [#allocation12], %s1898_s10 }
  0x8b   : > { %1474 = dma.done.wait (%p1829_p6), %s365_s12, 1024  }
  0x8c   : > { %1476 = vsyncadd (%p1829_p6), %s365_s12, 4294966272  ;;  %p2090_p10 = scmp.eq.s32.totalorder %s1654_s23, 0 }
  0x8e   : > { %1478 = dma.done.wait (%p2090_p10), [#allocation14], 4096   ;;  %p2091_p2 = pmov %p2090_p10 }
  0x8f   : > { %s2092_s29 = sld [smem:[#allocation29_spill]]  ;;  %v1539_v0 = vmov 0.0   ;;  %v463_v1 = vld [vmem:[#allocation13 + $0x78] sm:$0xff]  ;;  %v462_v2 = vld [vmem:[#allocation13 + $0x70] sm:$0xff]  ;;  %v461_v3 = vld [vmem:[#allocation13 + $0x68] sm:$0xff]  ;;  %s1923_s23 = scalar_lea.vmem [#allocation16], %s1898_s10 }
  0x90   : > { %1480 = vsyncadd (%p2091_p2), [#allocation14], 4294963200  ;;  %513 = vst [vmem:[#allocation3] sm:$0xff] %v1539_v0  ;;  %913 = vmatpush.msra.mxu2 %v463_v1  ;;  %914 = vmatpush.msra.mxu3 %v463_v1  ;;  %v460_v4 = vld [vmem:[#allocation13 + $0x60] sm:$0xff]  ;;  %v459_v5 = vld [vmem:[#allocation13 + $0x58] sm:$0xff] }
  0x91   : > { %514 = vst [vmem:[#allocation3 + $0x18] sm:$0xff] %v1539_v0  ;;  %464 = vmatpush.msra.mxu0 %v463_v1  ;;  %912 = vmatpush.msra.mxu1 %v463_v1  ;;  %v458_v6 = vld [vmem:[#allocation13 + $0x50] sm:$0xff]  ;;  %v457_v7 = vld [vmem:[#allocation13 + $0x48] sm:$0xff]  ;;  %v456_v8 = vld [vmem:[#allocation13 + $0x40] sm:$0xff] }
  0x92   : > { %515 = vst [vmem:[#allocation3 + $0x10] sm:$0xff] %v1539_v0  ;;  %916 = vmatpush.msra.mxu2 %v462_v2  ;;  %917 = vmatpush.msra.mxu3 %v462_v2  ;;  %v455_v9 = vld [vmem:[#allocation13 + $0x38] sm:$0xff]  ;;  %v454_v10 = vld [vmem:[#allocation13 + $0x30] sm:$0xff]  ;;  %v453_v11 = vld [vmem:[#allocation13 + $0x28] sm:$0xff] }
  0x93   : > { %516 = vst [vmem:[#allocation3 + $0x20] sm:$0xff] %v1539_v0  ;;  %465 = vmatpush.msra.mxu0 %v462_v2  ;;  %915 = vmatpush.msra.mxu1 %v462_v2  ;;  %v452_v12 = vld [vmem:[#allocation13 + $0x20] sm:$0xff]  ;;  %v451_v13 = vld [vmem:[#allocation13 + $0x18] sm:$0xff]  ;;  %v450_v14 = vld [vmem:[#allocation13 + $0x10] sm:$0xff] }
  0x94   : > { %517 = vst [vmem:[#allocation3 + $0x28] sm:$0xff] %v1539_v0  ;;  %919 = vmatpush.msra.mxu2 %v461_v3  ;;  %920 = vmatpush.msra.mxu3 %v461_v3  ;;  %v449_v15 = vld [vmem:[#allocation13 + $0x8] sm:$0xff]  ;;  %v448_v16 = vld [vmem:[#allocation13] sm:$0xff]  ;;  %v446_v18 = vld [vmem:[%s1901_s25 + $0x30] sm:$0xff] }
  0x95   : > { %s1912_s14 = sld [smem:[#allocation6 + %s2092_s29]]  ;;  %518 = vst [vmem:[#allocation3 + $0x8] sm:$0xff] %v1539_v0  ;;  %466 = vmatpush.msra.mxu0 %v461_v3  ;;  %918 = vmatpush.msra.mxu1 %v461_v3  ;;  %v444_v17 = vld [vmem:[%s1901_s25 + $0x20] sm:$0xff]  ;;  %v442_v20 = vld [vmem:[%s1901_s25 + $0x10] sm:$0xff]  ;;  %v445_v21 = vld [vmem:[%s1901_s25 + $0x28] sm:$0xff] }
  0x96   : > { %519 = vst [vmem:[#allocation3 + $0x30] sm:$0xff] %v1539_v0  ;;  %922 = vmatpush.msra.mxu2 %v460_v4  ;;  %923 = vmatpush.msra.mxu3 %v460_v4  ;;  %v440_v19 = vld [vmem:[%s1901_s25] sm:$0xff]  ;;  %v447_v22 = vld [vmem:[%s1901_s25 + $0x38] sm:$0xff]  ;;  %v441_v23 = vld [vmem:[%s1901_s25 + $0x8] sm:$0xff] }
  0x97   : > { %520 = vst [vmem:[#allocation3 + $0x38] sm:$0xff] %v1539_v0  ;;  %467 = vmatpush.msra.mxu0 %v460_v4  ;;  %921 = vmatpush.msra.mxu1 %v460_v4  ;;  %v443_v24 = vld [vmem:[%s1901_s25 + $0x18] sm:$0xff] }
  0x98   : > { %925 = vmatpush.msra.mxu2 %v459_v5  ;;  %926 = vmatpush.msra.mxu3 %v459_v5 }
  0x99   : > { %468 = vmatpush.msra.mxu0 %v459_v5  ;;  %924 = vmatpush.msra.mxu1 %v459_v5 }
  0x9a   : > { %928 = vmatpush.msra.mxu2 %v458_v6  ;;  %929 = vmatpush.msra.mxu3 %v458_v6 }
  0x9b   : > { %469 = vmatpush.msra.mxu0 %v458_v6  ;;  %927 = vmatpush.msra.mxu1 %v458_v6  ;;  %p903_p6 = scmp.le.s32.totalorder %s1912_s14, 0 }
  0x9c   : > { %931 = vmatpush.msra.mxu2 %v457_v7  ;;  %932 = vmatpush.msra.mxu3 %v457_v7 }
  0x9d   : > { %470 = vmatpush.msra.mxu0 %v457_v7  ;;  %930 = vmatpush.msra.mxu1 %v457_v7 }
  0x9e   : > { %934 = vmatpush.msra.mxu2 %v456_v8  ;;  %935 = vmatpush.msra.mxu3 %v456_v8 }
  0x9f   : > { %471 = vmatpush.msra.mxu0 %v456_v8  ;;  %933 = vmatpush.msra.mxu1 %v456_v8 }
  0xa0   : > { %937 = vmatpush.msra.mxu2 %v455_v9  ;;  %938 = vmatpush.msra.mxu3 %v455_v9 }
  0xa1   : > { %472 = vmatpush.msra.mxu0 %v455_v9  ;;  %936 = vmatpush.msra.mxu1 %v455_v9 }
  0xa2   : > { %940 = vmatpush.msra.mxu2 %v454_v10  ;;  %941 = vmatpush.msra.mxu3 %v454_v10 }
  0xa3   : > { %473 = vmatpush.msra.mxu0 %v454_v10  ;;  %939 = vmatpush.msra.mxu1 %v454_v10 }
  0xa4   : > { %943 = vmatpush.msra.mxu2 %v453_v11  ;;  %944 = vmatpush.msra.mxu3 %v453_v11 }
  0xa5   : > { %474 = vmatpush.msra.mxu0 %v453_v11  ;;  %942 = vmatpush.msra.mxu1 %v453_v11 }
  0xa6   : > { %946 = vmatpush.msra.mxu2 %v452_v12  ;;  %947 = vmatpush.msra.mxu3 %v452_v12 }
  0xa7   : > { %475 = vmatpush.msra.mxu0 %v452_v12  ;;  %945 = vmatpush.msra.mxu1 %v452_v12 }
  0xa8   : > { %949 = vmatpush.msra.mxu2 %v451_v13  ;;  %950 = vmatpush.msra.mxu3 %v451_v13 }
  0xa9   : > { %476 = vmatpush.msra.mxu0 %v451_v13  ;;  %948 = vmatpush.msra.mxu1 %v451_v13 }
  0xaa   : > { %952 = vmatpush.msra.mxu2 %v450_v14  ;;  %953 = vmatpush.msra.mxu3 %v450_v14 }
  0xab   : > { %477 = vmatpush.msra.mxu0 %v450_v14  ;;  %951 = vmatpush.msra.mxu1 %v450_v14 }
  0xac   : > { %955 = vmatpush.msra.mxu2 %v449_v15  ;;  %956 = vmatpush.msra.mxu3 %v449_v15 }
  0xad   : > { %478 = vmatpush.msra.mxu0 %v449_v15  ;;  %954 = vmatpush.msra.mxu1 %v449_v15 }
  0xae   : > { %958 = vmatpush.msra.mxu2 %v448_v16  ;;  %959 = vmatpush.msra.mxu3 %v448_v16 }
  0xaf   : > { %492 = vmatmul.f32.vlgmr.msra.gmra.mxu2 %v444_v17  ;;  %498 = vmatmul.f32.vlgmr.msra.gmra.mxu3 %v446_v18 }
  0xb0   : > { %479 = vmatpush.msra.mxu0 %v448_v16  ;;  %957 = vmatpush.msra.mxu1 %v448_v16 }
  0xb1   : > { %480 = vmatmul.f32.vlgmr.msra.gmra.mxu0 %v440_v19  ;;  %486 = vmatmul.f32.vlgmr.msra.gmra.mxu1 %v442_v20 }
  0xb7   : > { %495 = vmatmul.f32.gmra.mxu2 %v445_v21  ;;  %501 = vmatmul.f32.gmra.mxu3 %v447_v22 }
  0xb9   : > { %483 = vmatmul.f32.gmra.mxu0 %v441_v23  ;;  %489 = vmatmul.f32.gmra.mxu1 %v443_v24 }
 0x12e   : > { %v481_v25 = vpop.f32.mrf.mxu0  ;;  %v487_v26 = vpop.f32.mrf.mxu1 }
 0x12f   : > { %505 = vst [vmem:[#allocation2 + $0x30] sm:$0xff] %v481_v25 }
 0x130   : > { %507 = vst [vmem:[#allocation2 + $0x18] sm:$0xff] %v487_v26 }
 0x132   : > { %v493_v27 = vpop.f32.mrf.mxu2  ;;  %v499_v28 = vpop.f32.mrf.mxu3 }
 0x133   : > { %509 = vst [vmem:[#allocation2 + $0x8] sm:$0xff] %v493_v27 }
 0x134   : > { %511 = vst [vmem:[#allocation2 + $0x28] sm:$0xff] %v499_v28 }
 0x136   : > { %v484_v29 = vpop.f32.mrf.mxu0  ;;  %v490_v30 = vpop.f32.mrf.mxu1 }
 0x137   : > { %506 = vst [vmem:[#allocation2] sm:$0xff] %v484_v29 }
 0x138   : > { %508 = vst [vmem:[#allocation2 + $0x10] sm:$0xff] %v490_v30  ;;  %525 = sbr.rel (%p903_p6) target bundleno = 493 (0x1ed), region = 72 }
 0x13a   : > { %v496_v31 = vpop.f32.mrf.mxu2  ;;  %v502_v32 = vpop.f32.mrf.mxu3 }
 0x13b   : > { %510 = vst [vmem:[#allocation2 + $0x20] sm:$0xff] %v496_v31 }
 0x13c   : > { %512 = vst [vmem:[#allocation2 + $0x38] sm:$0xff] %v502_v32 }
 0x13d   : > { %v557_v33 = vld [vmem:[%s1889_s9 + $0x78] sm:$0xff]  ;;  %v556_v34 = vld [vmem:[%s1889_s9 + $0x70] sm:$0xff]  ;;  %v555_v35 = vld [vmem:[%s1889_s9 + $0x68] sm:$0xff] }
 0x13e   : > { %961 = vmatpush.msra.mxu2 %v557_v33  ;;  %962 = vmatpush.msra.mxu3 %v557_v33  ;;  %v554_v36 = vld [vmem:[%s1889_s9 + $0x60] sm:$0xff]  ;;  %v553_v37 = vld [vmem:[%s1889_s9 + $0x58] sm:$0xff]  ;;  %v552_v38 = vld [vmem:[%s1889_s9 + $0x50] sm:$0xff] }
 0x13f   : > { %558 = vmatpush.msra.mxu0 %v557_v33  ;;  %960 = vmatpush.msra.mxu1 %v557_v33  ;;  %v551_v39 = vld [vmem:[%s1889_s9 + $0x48] sm:$0xff]  ;;  %v550_v40 = vld [vmem:[%s1889_s9 + $0x40] sm:$0xff]  ;;  %v549_v41 = vld [vmem:[%s1889_s9 + $0x38] sm:$0xff] }
 0x140   : > { %964 = vmatpush.msra.mxu2 %v556_v34  ;;  %965 = vmatpush.msra.mxu3 %v556_v34  ;;  %v548_v42 = vld [vmem:[%s1889_s9 + $0x30] sm:$0xff]  ;;  %v547_v43 = vld [vmem:[%s1889_s9 + $0x28] sm:$0xff]  ;;  %v546_v44 = vld [vmem:[%s1889_s9 + $0x20] sm:$0xff] }
 0x141   : > { %559 = vmatpush.msra.mxu0 %v556_v34  ;;  %963 = vmatpush.msra.mxu1 %v556_v34  ;;  %v545_v45 = vld [vmem:[%s1889_s9 + $0x18] sm:$0xff]  ;;  %v544_v46 = vld [vmem:[%s1889_s9 + $0x10] sm:$0xff]  ;;  %v543_v47 = vld [vmem:[%s1889_s9 + $0x8] sm:$0xff] }
 0x142   : > { %967 = vmatpush.msra.mxu2 %v555_v35  ;;  %968 = vmatpush.msra.mxu3 %v555_v35  ;;  %v542_v48 = vld [vmem:[%s1889_s9] sm:$0xff]  ;;  %v540_v50 = vld [vmem:[%s1881_s3 + $0x30] sm:$0xff]  ;;  %v539_v53 = vld [vmem:[%s1881_s3 + $0x28] sm:$0xff] }
 0x143   : > { %560 = vmatpush.msra.mxu0 %v555_v35  ;;  %966 = vmatpush.msra.mxu1 %v555_v35  ;;  %v538_v49 = vld [vmem:[%s1881_s3 + $0x20] sm:$0xff]  ;;  %v536_v52 = vld [vmem:[%s1881_s3 + $0x10] sm:$0xff]  ;;  %v541_v54 = vld [vmem:[%s1881_s3 + $0x38] sm:$0xff] }
 0x144   : > { %970 = vmatpush.msra.mxu2 %v554_v36  ;;  %971 = vmatpush.msra.mxu3 %v554_v36  ;;  %v534_v51 = vld [vmem:[%s1881_s3] sm:$0xff]  ;;  %v535_v55 = vld [vmem:[%s1881_s3 + $0x8] sm:$0xff]  ;;  %v537_v56 = vld [vmem:[%s1881_s3 + $0x18] sm:$0xff] }
 0x145   : > { %561 = vmatpush.msra.mxu0 %v554_v36  ;;  %969 = vmatpush.msra.mxu1 %v554_v36  ;;  %v526_v57 = vld [vmem:[#allocation3] sm:$0xff]  ;;  %v528_v58 = vld [vmem:[#allocation3 + $0x10] sm:$0xff]  ;;  %v530_v63 = vld [vmem:[#allocation3 + $0x28] sm:$0xff] }
 0x146   : > { %973 = vmatpush.msra.mxu2 %v553_v37  ;;  %974 = vmatpush.msra.mxu3 %v553_v37  ;;  %v532_v0 = vld [vmem:[#allocation3 + $0x30] sm:$0xff]  ;;  %v527_v5 = vld [vmem:[#allocation3 + $0x18] sm:$0xff]  ;;  %v529_v6 = vld [vmem:[#allocation3 + $0x20] sm:$0xff] }
 0x147   : > { %562 = vmatpush.msra.mxu0 %v553_v37  ;;  %972 = vmatpush.msra.mxu1 %v553_v37  ;;  %v531_v11 = vld [vmem:[#allocation3 + $0x8] sm:$0xff]  ;;  %v533_v12 = vld [vmem:[#allocation3 + $0x38] sm:$0xff] }
 0x148   : > { %976 = vmatpush.msra.mxu2 %v552_v38  ;;  %977 = vmatpush.msra.mxu3 %v552_v38 }
 0x149   : > { %563 = vmatpush.msra.mxu0 %v552_v38  ;;  %975 = vmatpush.msra.mxu1 %v552_v38 }
 0x14a   : > { %979 = vmatpush.msra.mxu2 %v551_v39  ;;  %980 = vmatpush.msra.mxu3 %v551_v39 }
 0x14b   : > { %564 = vmatpush.msra.mxu0 %v551_v39  ;;  %978 = vmatpush.msra.mxu1 %v551_v39 }
 0x14c   : > { %982 = vmatpush.msra.mxu2 %v550_v40  ;;  %983 = vmatpush.msra.mxu3 %v550_v40 }
 0x14d   : > { %565 = vmatpush.msra.mxu0 %v550_v40  ;;  %981 = vmatpush.msra.mxu1 %v550_v40 }
 0x14e   : > { %985 = vmatpush.msra.mxu2 %v549_v41  ;;  %986 = vmatpush.msra.mxu3 %v549_v41 }
 0x14f   : > { %566 = vmatpush.msra.mxu0 %v549_v41  ;;  %984 = vmatpush.msra.mxu1 %v549_v41 }
 0x150   : > { %988 = vmatpush.msra.mxu2 %v548_v42  ;;  %989 = vmatpush.msra.mxu3 %v548_v42 }
 0x151   : > { %567 = vmatpush.msra.mxu0 %v548_v42  ;;  %987 = vmatpush.msra.mxu1 %v548_v42 }
 0x152   : > { %991 = vmatpush.msra.mxu2 %v547_v43  ;;  %992 = vmatpush.msra.mxu3 %v547_v43 }
 0x153   : > { %568 = vmatpush.msra.mxu0 %v547_v43  ;;  %990 = vmatpush.msra.mxu1 %v547_v43 }
 0x154   : > { %994 = vmatpush.msra.mxu2 %v546_v44  ;;  %995 = vmatpush.msra.mxu3 %v546_v44 }
 0x155   : > { %569 = vmatpush.msra.mxu0 %v546_v44  ;;  %993 = vmatpush.msra.mxu1 %v546_v44 }
 0x156   : > { %997 = vmatpush.msra.mxu2 %v545_v45  ;;  %998 = vmatpush.msra.mxu3 %v545_v45 }
 0x157   : > { %570 = vmatpush.msra.mxu0 %v545_v45  ;;  %996 = vmatpush.msra.mxu1 %v545_v45 }
 0x158   : > { %1000 = vmatpush.msra.mxu2 %v544_v46  ;;  %1001 = vmatpush.msra.mxu3 %v544_v46 }
 0x159   : > { %571 = vmatpush.msra.mxu0 %v544_v46  ;;  %999 = vmatpush.msra.mxu1 %v544_v46 }
 0x15a   : > { %1003 = vmatpush.msra.mxu2 %v543_v47  ;;  %1004 = vmatpush.msra.mxu3 %v543_v47 }
 0x15b   : > { %572 = vmatpush.msra.mxu0 %v543_v47  ;;  %1002 = vmatpush.msra.mxu1 %v543_v47 }
 0x15c   : > { %1006 = vmatpush.msra.mxu2 %v542_v48  ;;  %1007 = vmatpush.msra.mxu3 %v542_v48 }
 0x15d   : > { %586 = vmatmul.f32.vlgmr.msra.gmra.mxu2 %v538_v49  ;;  %592 = vmatmul.f32.vlgmr.msra.gmra.mxu3 %v540_v50 }
 0x15e   : > { %573 = vmatpush.msra.mxu0 %v542_v48  ;;  %1005 = vmatpush.msra.mxu1 %v542_v48 }
 0x15f   : > { %574 = vmatmul.f32.vlgmr.msra.gmra.mxu0 %v534_v51  ;;  %580 = vmatmul.f32.vlgmr.msra.gmra.mxu1 %v536_v52 }
 0x165   : > { %589 = vmatmul.f32.gmra.mxu2 %v539_v53  ;;  %595 = vmatmul.f32.gmra.mxu3 %v541_v54 }
 0x167   : > { %577 = vmatmul.f32.gmra.mxu0 %v535_v55  ;;  %583 = vmatmul.f32.gmra.mxu1 %v537_v56 }
 0x1dc   : > { %v575_v59 = vpop.f32.mrf.mxu0  ;;  %v581_v60 = vpop.f32.mrf.mxu1 }
 0x1dd   : > { %v599_v61 = vadd.f32 %v575_v59, %v526_v57  ;;  %v601_v62 = vadd.f32 %v581_v60, %v528_v58 }
 0x1df   : > { %607 = vst [vmem:[#allocation3] sm:$0xff] %v599_v61 }
 0x1e0   : > { %609 = vst [vmem:[#allocation3 + $0x10] sm:$0xff] %v601_v62  ;;  %v587_v1 = vpop.f32.mrf.mxu2  ;;  %v593_v2 = vpop.f32.mrf.mxu3 }
 0x1e1   : > { %v603_v3 = vadd.f32 %v587_v1, %v530_v63  ;;  %v605_v4 = vadd.f32 %v593_v2, %v532_v0 }
 0x1e3   : > { %611 = vst [vmem:[#allocation3 + $0x28] sm:$0xff] %v603_v3 }
 0x1e4   : > { %613 = vst [vmem:[#allocation3 + $0x30] sm:$0xff] %v605_v4  ;;  %v578_v7 = vpop.f32.mrf.mxu0  ;;  %v584_v8 = vpop.f32.mrf.mxu1 }
 0x1e5   : > { %v600_v9 = vadd.f32 %v578_v7, %v527_v5  ;;  %v602_v10 = vadd.f32 %v584_v8, %v529_v6 }
 0x1e7   : > { %608 = vst [vmem:[#allocation3 + $0x18] sm:$0xff] %v600_v9 }
 0x1e8   : > { %610 = vst [vmem:[#allocation3 + $0x20] sm:$0xff] %v602_v10  ;;  %v590_v13 = vpop.f32.mrf.mxu2  ;;  %v596_v14 = vpop.f32.mrf.mxu3 }
 0x1e9   : > { %v604_v15 = vadd.f32 %v590_v13, %v531_v11  ;;  %v606_v16 = vadd.f32 %v596_v14, %v533_v12 }
 0x1eb   : > { %612 = vst [vmem:[#allocation3 + $0x8] sm:$0xff] %v604_v15 }
 0x1ec   : > { %614 = vst [vmem:[#allocation3 + $0x38] sm:$0xff] %v606_v16 }
 0x1ed PF: > { %v649_v17 = vld [vmem:[#allocation15 + $0x78] sm:$0xff]  ;;  %v648_v18 = vld [vmem:[#allocation15 + $0x70] sm:$0xff]  ;;  %v647_v19 = vld [vmem:[#allocation15 + $0x68] sm:$0xff]  ;;  %s2093_s4 = sld [smem:[#allocation41_spill]]  ;;  %s732_s27 = sshll.u32 %s1923_s23, 4  ;;  %s733_s27 = int_to_ptr.vmem [resolvable:$true] %s732_s27 }
 0x1ee   : > { %1009 = vmatpush.msra.mxu2 %v649_v17  ;;  %1010 = vmatpush.msra.mxu3 %v649_v17  ;;  %v646_v20 = vld [vmem:[#allocation15 + $0x60] sm:$0xff]  ;;  %v645_v21 = vld [vmem:[#allocation15 + $0x58] sm:$0xff]  ;;  %v644_v22 = vld [vmem:[#allocation15 + $0x50] sm:$0xff]  ;;  %s2094_s20 = sld [smem:[#allocation29_spill]]  ;;  %s720_s11 = scalar_lea.sflag [#allocation9], %s376_s7 }
 0x1ef   : > { %650 = vmatpush.msra.mxu0 %v649_v17  ;;  %1008 = vmatpush.msra.mxu1 %v649_v17  ;;  %v643_v23 = vld [vmem:[#allocation15 + $0x48] sm:$0xff]  ;;  %v642_v24 = vld [vmem:[#allocation15 + $0x40] sm:$0xff]  ;;  %v641_v25 = vld [vmem:[#allocation15 + $0x38] sm:$0xff]  ;;  %s2095_s3 = sld [smem:[#allocation42_spill]] }
 0x1f0   : > { %1012 = vmatpush.msra.mxu2 %v648_v18  ;;  %1013 = vmatpush.msra.mxu3 %v648_v18  ;;  %v640_v26 = vld [vmem:[#allocation15 + $0x30] sm:$0xff]  ;;  %v639_v27 = vld [vmem:[#allocation15 + $0x28] sm:$0xff]  ;;  %v638_v28 = vld [vmem:[#allocation15 + $0x20] sm:$0xff] }
 0x1f1   : > { %651 = vmatpush.msra.mxu0 %v648_v18  ;;  %1011 = vmatpush.msra.mxu1 %v648_v18  ;;  %v637_v29 = vld [vmem:[#allocation15 + $0x18] sm:$0xff]  ;;  %v636_v30 = vld [vmem:[#allocation15 + $0x10] sm:$0xff]  ;;  %v635_v31 = vld [vmem:[#allocation15 + $0x8] sm:$0xff] }
 0x1f2   : > { %1015 = vmatpush.msra.mxu2 %v647_v19  ;;  %1016 = vmatpush.msra.mxu3 %v647_v19  ;;  %v634_v32 = vld [vmem:[#allocation15] sm:$0xff]  ;;  %v630_v33 = vld [vmem:[#allocation3 + $0x28] sm:$0xff]  ;;  %v632_v34 = vld [vmem:[#allocation3 + $0x30] sm:$0xff] }
 0x1f3   : > { %652 = vmatpush.msra.mxu0 %v647_v19  ;;  %1014 = vmatpush.msra.mxu1 %v647_v19  ;;  %v626_v35 = vld [vmem:[#allocation3] sm:$0xff]  ;;  %v628_v36 = vld [vmem:[#allocation3 + $0x10] sm:$0xff]  ;;  %v631_v37 = vld [vmem:[#allocation3 + $0x8] sm:$0xff] }
 0x1f4   : > { %1018 = vmatpush.msra.mxu2 %v646_v20  ;;  %1019 = vmatpush.msra.mxu3 %v646_v20  ;;  %v633_v38 = vld [vmem:[#allocation3 + $0x38] sm:$0xff]  ;;  %v629_v40 = vld [vmem:[#allocation3 + $0x20] sm:$0xff]  ;;  %v618_v41 = vld [vmem:[#allocation2 + $0x30] sm:$0xff]  ;;  %s911_s26 = sshll.u32 %s2094_s20, 6 }
 0x1f5   : > { %653 = vmatpush.msra.mxu0 %v646_v20  ;;  %1017 = vmatpush.msra.mxu1 %v646_v20  ;;  %v627_v39 = vld [vmem:[#allocation3 + $0x18] sm:$0xff]  ;;  %v1212_v43 = vld [vmem:[%s2093_s4] ss:$0 sm:$0xff]  ;;  %v622_v48 = vld [vmem:[#allocation2 + $0x8] sm:$0xff]  ;;  %s731_s2 = scalar_lea.hbm %s2095_s3, %s911_s26  ;;  %s1407_s25 = scalar_lea.hbm %s2095_s3, 128 }
 0x1f6   : > { %1021 = vmatpush.msra.mxu2 %v645_v21  ;;  %1022 = vmatpush.msra.mxu3 %v645_v21  ;;  %v620_v42 = vld [vmem:[#allocation2 + $0x18] sm:$0xff]  ;;  %v624_v49 = vld [vmem:[#allocation2 + $0x28] sm:$0xff]  ;;  %v619_v56 = vld [vmem:[#allocation2] sm:$0xff]  ;;  %s734_s8 = sshll.u32 %s731_s2, 4  ;;  %s735_s8 = int_to_ptr.hbm [resolvable:$true] %s734_s8 }
 0x1f7   : > { %654 = vmatpush.msra.mxu0 %v645_v21  ;;  %1020 = vmatpush.msra.mxu1 %v645_v21  ;;  %v621_v57 = vld [vmem:[#allocation2 + $0x10] sm:$0xff]  ;;  %v623_v0 = vld [vmem:[#allocation2 + $0x20] sm:$0xff]  ;;  %v625_v1 = vld [vmem:[#allocation2 + $0x38] sm:$0xff]  ;;  %s1401_s15 = sshra.s32 %s735_s8, 4  ;;  %s1402_s15 = int_to_ptr.hbm [resolvable:$true] %s1401_s15 }
 0x1f8   : > { %1024 = vmatpush.msra.mxu2 %v644_v22  ;;  %1025 = vmatpush.msra.mxu3 %v644_v22  ;;  %s1403_s12 = scalar_lea.hbm %s1402_s15, 64  ;;  %p1408_p9 = scmp.lt.s32.totalorder %s1402_s15, %s2095_s3 }
 0x1f9   : > { %655 = vmatpush.msra.mxu0 %v644_v22  ;;  %1023 = vmatpush.msra.mxu1 %v644_v22  ;;  %p1404_p8 = scmp.ne.s32.totalorder %s1402_s15, %s1403_s12  ;;  %p1409_p13 = scmp.lt.s32.totalorder %s1407_s25, %s1403_s12 }
 0x1fa   : > { %1027 = vmatpush.msra.mxu2 %v643_v23  ;;  %1028 = vmatpush.msra.mxu3 %v643_v23 }
 0x1fb   : > { %656 = vmatpush.msra.mxu0 %v643_v23  ;;  %1026 = vmatpush.msra.mxu1 %v643_v23  ;;  %p1405_p3 = pnand %p1404_p8, %p1835_p7  ;;  %p1410_p1 = por %p1409_p13, %p1408_p9 }
 0x1fc   : > { %1030 = vmatpush.msra.mxu2 %v642_v24  ;;  %1031 = vmatpush.msra.mxu3 %v642_v24 }
 0x1fd   : > { %657 = vmatpush.msra.mxu0 %v642_v24  ;;  %1029 = vmatpush.msra.mxu1 %v642_v24  ;;  %p1406_p12 = pneg %p1405_p3 }
 0x1fe   : > { %1033 = vmatpush.msra.mxu2 %v641_v25  ;;  %1034 = vmatpush.msra.mxu3 %v641_v25 }
 0x1ff   : > { %658 = vmatpush.msra.mxu0 %v641_v25  ;;  %1032 = vmatpush.msra.mxu1 %v641_v25  ;;  %p1411_p11 = pnand %p1410_p1, %p1406_p12 }
 0x200   : > { %1036 = vmatpush.msra.mxu2 %v640_v26  ;;  %1037 = vmatpush.msra.mxu3 %v640_v26 }
 0x201   : > { %659 = vmatpush.msra.mxu0 %v640_v26  ;;  %1035 = vmatpush.msra.mxu1 %v640_v26 }
 0x202   : > { %1039 = vmatpush.msra.mxu2 %v639_v27  ;;  %1040 = vmatpush.msra.mxu3 %v639_v27 }
 0x203   : > { %660 = vmatpush.msra.mxu0 %v639_v27  ;;  %1038 = vmatpush.msra.mxu1 %v639_v27 }
 0x204   : > { %1042 = vmatpush.msra.mxu2 %v638_v28  ;;  %1043 = vmatpush.msra.mxu3 %v638_v28 }
 0x205   : > { %661 = vmatpush.msra.mxu0 %v638_v28  ;;  %1041 = vmatpush.msra.mxu1 %v638_v28 }
 0x206   : > { %1045 = vmatpush.msra.mxu2 %v637_v29  ;;  %1046 = vmatpush.msra.mxu3 %v637_v29 }
 0x207   : > { %662 = vmatpush.msra.mxu0 %v637_v29  ;;  %1044 = vmatpush.msra.mxu1 %v637_v29 }
 0x208   : > { %1048 = vmatpush.msra.mxu2 %v636_v30  ;;  %1049 = vmatpush.msra.mxu3 %v636_v30 }
 0x209   : > { %663 = vmatpush.msra.mxu0 %v636_v30  ;;  %1047 = vmatpush.msra.mxu1 %v636_v30 }
 0x20a   : > { %1051 = vmatpush.msra.mxu2 %v635_v31  ;;  %1052 = vmatpush.msra.mxu3 %v635_v31 }
 0x20b   : > { %664 = vmatpush.msra.mxu0 %v635_v31  ;;  %1050 = vmatpush.msra.mxu1 %v635_v31 }
 0x20c   : > { %1054 = vmatpush.msra.mxu2 %v634_v32  ;;  %1055 = vmatpush.msra.mxu3 %v634_v32 }
 0x20d   : > { %678 = vmatmul.f32.vlgmr.msra.gmra.mxu2 %v630_v33  ;;  %684 = vmatmul.f32.vlgmr.msra.gmra.mxu3 %v632_v34 }
 0x20e   : > { %665 = vmatpush.msra.mxu0 %v634_v32  ;;  %1053 = vmatpush.msra.mxu1 %v634_v32 }
 0x20f   : > { %666 = vmatmul.f32.vlgmr.msra.gmra.mxu0 %v626_v35  ;;  %672 = vmatmul.f32.vlgmr.msra.gmra.mxu1 %v628_v36 }
 0x215   : > { %681 = vmatmul.f32.gmra.mxu2 %v631_v37  ;;  %687 = vmatmul.f32.gmra.mxu3 %v633_v38 }
 0x217   : > { %669 = vmatmul.f32.gmra.mxu0 %v627_v39  ;;  %675 = vmatmul.f32.gmra.mxu1 %v629_v40 }
 0x28c   : > { %v667_v44 = vpop.f32.mrf.mxu0  ;;  %v673_v45 = vpop.f32.mrf.mxu1 }
 0x28d   : > { %v691_v46 = vadd.f32 %v667_v44, %v618_v41  ;;  %v693_v47 = vadd.f32 %v673_v45, %v620_v42 }
 0x28f   : > { %v703_v50 = vadd.f32 %v1212_v43, %v691_v46  ;;  %v705_v51 = vadd.f32 %v1212_v43, %v693_v47 }
 0x290   : > { %v679_v52 = vpop.f32.mrf.mxu2  ;;  %v685_v53 = vpop.f32.mrf.mxu3 }
 0x291   : > { %711 = vst [vmem:[%s1923_s23] sm:$0xff] %v703_v50  ;;  %v695_v54 = vadd.f32 %v679_v52, %v622_v48  ;;  %v697_v55 = vadd.f32 %v685_v53, %v624_v49 }
 0x292   : > { %713 = vst [vmem:[%s1923_s23 + $0x10] sm:$0xff] %v705_v51 }
 0x293   : > { %v707_v58 = vadd.f32 %v1212_v43, %v695_v54  ;;  %v709_v59 = vadd.f32 %v1212_v43, %v697_v55 }
 0x294   : > { %v670_v60 = vpop.f32.mrf.mxu0  ;;  %v676_v61 = vpop.f32.mrf.mxu1 }
 0x295   : > { %715 = vst [vmem:[%s1923_s23 + $0x20] sm:$0xff] %v707_v58  ;;  %v692_v62 = vadd.f32 %v670_v60, %v619_v56  ;;  %v694_v63 = vadd.f32 %v676_v61, %v621_v57 }
 0x296   : > { %717 = vst [vmem:[%s1923_s23 + $0x30] sm:$0xff] %v709_v59 }
 0x297   : > { %v704_v2 = vadd.f32 %v1212_v43, %v692_v62  ;;  %v706_v3 = vadd.f32 %v1212_v43, %v694_v63 }
 0x298   : > { %v682_v4 = vpop.f32.mrf.mxu2  ;;  %v688_v5 = vpop.f32.mrf.mxu3 }
 0x299   : > { %712 = vst [vmem:[%s1923_s23 + $0x8] sm:$0xff] %v704_v2  ;;  %v696_v6 = vadd.f32 %v682_v4, %v623_v0  ;;  %v698_v7 = vadd.f32 %v688_v5, %v625_v1 }
 0x29a   : > { %714 = vst [vmem:[%s1923_s23 + $0x18] sm:$0xff] %v706_v3 }
 0x29b   : > { %v708_v8 = vadd.f32 %v1212_v43, %v696_v6  ;;  %v710_v9 = vadd.f32 %v1212_v43, %v698_v7 }
 0x29d   : > { %716 = vst [vmem:[%s1923_s23 + $0x28] sm:$0xff] %v708_v8 }
 0x29e   : > { %718 = vst [vmem:[%s1923_s23 + $0x38] sm:$0xff] %v710_v9 }
 0x29f   : > { %1414 = shalt.err (!%p1411_p11)
}
 0x2a0   : > { %s1540_s7 = smov 128   ;;  %s1541_s23 = smov 8  }
 0x2a1   : > { %1074 = dma.vmem_to_hbm [thread:$0]  (%p1835_p7), %s733_s27, 1024, %s735_s8, %s720_s11, %s1540_s7, %s1540_s7, %s1541_s23  }
 0x2a2 PF: > { %s749_s16 = sand.u32 1, %s1487_s0   ;;  %p2096_p5 = scmp.ge.s32.totalorder %s1531_s22, 2 }
 0x2a3   : > { %s750_s30 = scalar_lea.sflag [#allocation9], %s749_s16 }
 0x2a4   : > { %p1098_p4 = pnand %p2096_p5, %p1863_p0 }
 0x2a6   : > { %p1099_p10 = pneg %p1098_p4 }
 0x2a8   : > { %1482 = dma.done.wait (%p1099_p10), %s750_s30, 1024  }
 0x2a9   : > { %1484 = vsyncadd (%p1099_p10), %s750_s30, 4294966272  ;;  %s41_s22 = sadd.s32 1, %s1531_s22   ;;  %s2097_s14 = sld [smem:[#allocation27_spill]] }
 0x2aa   : > { %p38_p2 = scmp.ge.s32.totalorder %s41_s22, 4   ;;  %s2098_s15 = sld [smem:[#allocation28_spill]] }
 0x2ab   : > { %s2099_s16 = sld [smem:[#allocation34_spill]]  ;;  %s2102_s0 = smov %s1491_s13 }
 0x2ac   : > { %s2100_s4 = sld [smem:[#allocation35_spill]]  ;;  %s2103_s13 = smov %s1495_s1 }
 0x2ad   : > { %s2101_s6 = sld [smem:[#allocation31_spill]]  ;;  %s2104_s1 = smov %s1809_s24 }
 0x2ae   : > { %s2105_s17 = smov %s1515_s18  ;;  %s2106_s18 = smov %s1519_s19 }
 0x2af   : > { %s2108_s20 = smov %s1527_s21  ;;  %40 = sbr.rel (!%p38_p2) target bundleno = 25 (0x19), region = 133 }
 0x2b2   : > { %s2107_s19 = smov %s2100_s4 }
 0x2b3   : > { %s2109_s21 = smov %s2101_s6 }
 0x2b4   :  { %756 = vsyncpa [#allocation8], 1 }
 0x2b5   :  { %758 = vsyncpa [#allocation8 + $0x1], 1 }
 0x2b6   :  { %759 = vsyncpa [#allocation11], 1 }
 0x2b7   :  { %761 = vsyncpa [#allocation11 + $0x1], 1 }
 0x2b8   :  { %762 = vsyncpa [#allocation14], 1 }
 0x2b9   :  { %763 = vsyncpa [#allocation9], 1 }
 0x2ba   :  { %765 = vsyncpa [#allocation9 + $0x1], 1 }

</bundles_post_ra>
